<compile_context>
chip_gen: v6e
topology: v6e:2x2x1
jax: 0.10.0
libtpu: 0.0.40
codegen_flags: <defaults>
</compile_context>

<pallas_src>
import jax
import jax.numpy as jnp
from jax.experimental import pallas as pl
from jax.experimental.pallas import tpu as pltpu


def _augmentor_rotation_kernel(x_ref, w1_ref, b1_ref, w2t_ref, b2_ref,
                               w3t_ref, b3_ref, o_ref):
    # ----- layer 1, untransposed: (TB, D) @ (D, 32) on the MXU --------------
    h1_nt = jnp.dot(x_ref[...], w1_ref[...],
                    preferred_element_type=jnp.float32) + b1_ref[...]
    h1_nt = jnp.maximum(h1_nt, 0.0)                                 # (TB, 32)

    # Put batch on lanes by transposing only the small (TB, 32) activation
    # (4x smaller than transposing the (TB, 128) input tile).
    h1 = h1_nt.T                                                    # (32, TB)

    # ----- layers 2/3 lane-dense: (out,in) @ (in,TB) -------------------------
    h2 = jnp.dot(w2t_ref[...], h1,
                 preferred_element_type=jnp.float32) + b2_ref[...]
    h2 = jnp.maximum(h2, 0.0)                                       # (16, TB)
    q = jnp.dot(w3t_ref[...], h2,
                preferred_element_type=jnp.float32) + b3_ref[...]   # (4, TB)

    # ----- q += [1, 0, 0, 0]  (identity quaternion on the w component) -------
    qw = q[0:1, :] + 1.0
    qx = q[1:2, :]
    qy = q[2:3, :]
    qz = q[3:4, :]

    # ----- batch_quat_to_rotmat, fully lane-dense ((1, TB) rows) -------------
    len_q = qw * qw + qx * qx + qy * qy + qz * qz                   # (1, TB)
    # approx=False: approx reciprocal (~2^-12 rel err) would break 1e-5 tol.
    s = 2.0 * pl.reciprocal(len_q, approx=False)                    # EUP slot

    xx = qx * qx
    yy = qy * qy
    zz = qz * qz
    xy = qx * qy
    xz = qx * qz
    yz = qy * qz
    xw = qx * qw
    yw = qy * qw
    zw = qz * qw

    # One coalesced (9, TB) store instead of nine masked 1-sublane stores.
    rows = jnp.concatenate([
        1.0 - (yy + zz) * s,      # r00
        (xy - zw) * s,            # r01
        (xz + yw) * s,            # r02
        (xy + zw) * s,            # r10
        1.0 - (xx + zz) * s,      # r11
        (yz - xw) * s,            # r12
        (xz - yw) * s,            # r20
        (yz + xw) * s,            # r21
        1.0 - (xx + yy) * s,      # r22
    ], axis=0)
    o_ref[...] = rows


def _round_up(n, m):
    return ((n + m - 1) // m) * m


def augmentor_rotation_forward(x, params, *, block_b=4096, lane_major_out=False):
    """Matches Augmentor_Rotation.forward: returns (rotmat (B,3,3), None)."""
    assert block_b % 128 == 0, "block_b must be a multiple of 128"
    w1, b1, w2, b2, w3, b3 = params
    B, D = x.shape

    # Weights are tiny and stay resident in VMEM.  Layer 1 is used in its
    # natural (D, 32) orientation; layers 2/3 are pre-transposed so the kernel
    # runs (out,in) @ (in,TB) with batch on the lane axis.
    w1f = w1.astype(jnp.float32)                       # (D, 32)
    b1r = b1.reshape(1, -1).astype(jnp.float32)        # (1, 32)
    w2t = w2.T.astype(jnp.float32)                     # (16, 32)
    b2c = b2.reshape(-1, 1).astype(jnp.float32)        # (16, 1)
    w3t = w3.T.astype(jnp.float32)                     # (4, 16)
    b3c = b3.reshape(-1, 1).astype(jnp.float32)        # (4, 1)

    x = x.astype(jnp.float32)

    if B <= block_b:
        # Small batch: one lane-aligned tile; padding a small array is free.
        tb = _round_up(max(B, 1), 128)
        if tb != B:
            x = jnp.pad(x, ((0, tb - B), (0, 0)))
        b_pad = tb
    else:
        # Large batch: keep at least ~8 grid steps (feeds both v7x TCs and
        # keeps the DMA pipeline busy) but never drop below 1024 rows/tile.
        b_pad = B
        tb = min(block_b, max(1024, _round_up(-(-B // 8), 128)))

    grid = (pl.cdiv(b_pad, tb),)

    # Rough per-step VMEM estimate: double-buffered x tile + output slab +
    # kernel intermediates (+ headroom).  Only raise the scoped-VMEM limit
    # when an oversized tile would exceed the smallest (v5e) default.
    est_vmem = 2 * tb * D * 4 + 2 * 9 * tb * 4 + 130 * 4 * tb + (2 << 20)
    vmem_limit = None
    if est_vmem > (16 << 20):
        vmem_limit = int(min(est_vmem + (8 << 20), 56 << 20))

    def _resident(shape):
        # Constant block index across the grid -> fetched once, stays in VMEM.
        return pl.BlockSpec(shape, lambda i: (0, 0))

    out9 = pl.pallas_call(
        _augmentor_rotation_kernel,
        out_shape=jax.ShapeDtypeStruct((9, b_pad), jnp.float32),
        grid=grid,
        in_specs=[
            pl.BlockSpec((tb, D), lambda i: (i, 0)),    # x: streamed per tile
            _resident(w1f.shape), _resident(b1r.shape),
            _resident(w2t.shape), _resident(b2c.shape),
            _resident(w3t.shape), _resident(b3c.shape),
        ],
        out_specs=pl.BlockSpec((9, tb), lambda i: (0, i)),   # lane-dense slab
        compiler_params=pltpu.CompilerParams(
            dimension_semantics=("parallel",),
            vmem_limit_bytes=vmem_limit),
    )(x, w1f, b1r, w2t, b2c, w3t, b3c)

    if lane_major_out:
        # Consumer accepts the lane-dense (9, B) layout: skip the XLA
        # transpose and save ~13% of HBM traffic.
        return out9[:, :B], None
    rot = out9[:, :B].T.reshape(B, 3, 3)
    return rot, None


def _init_linear(key, fan_in, fan_out):
    # PyTorch nn.Linear default: U(-1/sqrt(fan_in), 1/sqrt(fan_in))
    kw, kb = jax.random.split(key)
    bound = 1.0 / jnp.sqrt(jnp.float32(fan_in))
    w = jax.random.uniform(kw, (fan_in, fan_out), jnp.float32, -bound, bound)
    b = jax.random.uniform(kb, (fan_out,), jnp.float32, -bound, bound)
    return w, b


def _reference_forward(x, params):
    """Pure-JAX reference reproducing the PyTorch Augmentor_Rotation.forward."""
    w1, b1, w2, b2, w3, b3 = params
    h1 = jax.nn.relu(x @ w1 + b1)
    h2 = jax.nn.relu(h1 @ w2 + b2)
    q = h2 @ w3 + b3
    q = q + jnp.array([1.0, 0.0, 0.0, 0.0], jnp.float32)
    len_q = jnp.sum(q ** 2, axis=1)
    s = 2.0 / len_q
    h = q[:, :, None] * q[:, None, :]
    out = jnp.stack([
        1 - (h[:, 2, 2] + h[:, 3, 3]) * s,
        (h[:, 1, 2] - h[:, 3, 0]) * s,
        (h[:, 1, 3] + h[:, 2, 0]) * s,
        (h[:, 1, 2] + h[:, 3, 0]) * s,
        1 - (h[:, 1, 1] + h[:, 3, 3]) * s,
        (h[:, 2, 3] - h[:, 1, 0]) * s,
        (h[:, 1, 3] - h[:, 2, 0]) * s,
        (h[:, 2, 3] + h[:, 1, 0]) * s,
        1 - (h[:, 1, 1] + h[:, 2, 2]) * s,
    ], axis=-1).reshape(-1, 3, 3)
    return out


# TODO(synk): the top-level Augmentor.forward (Python `random.uniform`
# branching, point_augment_utils.flip_in_center) is host-side control flow
# outside the scope of a single Pallas kernel; only Augmentor_Rotation is
# kernelized here.

if __name__ == "__main__":
    key = jax.random.PRNGKey(0)
    k_x, k_x2, k_x3, k1, k2, k3 = jax.random.split(key, 6)

    dim = 64
    D = dim + 64            # fc1 input features = dim + 64 = 128

    w1, b1 = _init_linear(k1, D, 32)
    w2, b2 = _init_linear(k2, 32, 16)
    w3, b3 = _init_linear(k3, 16, 4)
    params = (w1, b1, w2, b2, w3, b3)

    # --- small batch (single padded tile path, default block_b) ---
    B = 4
    x = jax.random.normal(k_x, (B, D), jnp.float32)
    rot, second = augmentor_rotation_forward(x, params)
    rot = jax.block_until_ready(rot)
    assert rot.shape == (B, 3, 3)
    assert second is None
    ref = _reference_forward(x, params)
    assert jnp.allclose(rot, ref, atol=1e-5, rtol=1e-5), "small-batch mismatch"

    # --- multi-step pipelined grid incl. a partial edge tile ---
    B2 = 320
    x2 = jax.random.normal(k_x2, (B2, D), jnp.float32)
    rot2, _ = augmentor_rotation_forward(x2, params, block_b=128)
    rot2 = jax.block_until_ready(rot2)
    assert rot2.shape == (B2, 3, 3)
    ref2 = _reference_forward(x2, params)
    assert jnp.allclose(rot2, ref2, atol=1e-5, rtol=1e-5), "grid-path mismatch"

    # --- large-batch heuristic path (tb clamp + partial edge, 1024-row tiles) ---
    B3 = 2500
    x3 = jax.random.normal(k_x3, (B3, D), jnp.float32)
    rot3, _ = augmentor_rotation_forward(x3, params, block_b=1024)
    rot3 = jax.block_until_ready(rot3)
    assert rot3.shape == (B3, 3, 3)
    ref3 = _reference_forward(x3, params)
    assert jnp.allclose(rot3, ref3, atol=1e-5, rtol=1e-5), "large-batch mismatch"

    print("KERNEL_OK")
</pallas_src>

<mosaic_0001>
module attributes {stable_mosaic.version = 11 : i64} {
  func.func @_augmentor_rotation_kernel(%arg0: i32, %arg1: memref<128x128xf32, #tpu.memory_space<vmem>>, %arg2: memref<128x32xf32, #tpu.memory_space<vmem>>, %arg3: memref<1x32xf32, #tpu.memory_space<vmem>>, %arg4: memref<16x32xf32, #tpu.memory_space<vmem>>, %arg5: memref<16x1xf32, #tpu.memory_space<vmem>>, %arg6: memref<4x16xf32, #tpu.memory_space<vmem>>, %arg7: memref<4x1xf32, #tpu.memory_space<vmem>>, %arg8: memref<9x128xf32, #tpu.memory_space<vmem>>) attributes {dimension_semantics = [#tpu.dimension_semantics<parallel>], iteration_bounds = array<i64: 1>, scalar_prefetch = 0 : i64, scratch_operands = 0 : i64, tpu.core_type = #tpu.core_type<tc>, window_params = [{transform_indices = @transform_0, window_bounds = array<i64: 128, 128>}, {pipeline_mode = #tpu.pipeline_mode<synchronous>, transform_indices = @transform_1, window_bounds = array<i64: 128, 32>}, {pipeline_mode = #tpu.pipeline_mode<synchronous>, transform_indices = @transform_2, window_bounds = array<i64: 1, 32>}, {pipeline_mode = #tpu.pipeline_mode<synchronous>, transform_indices = @transform_3, window_bounds = array<i64: 16, 32>}, {pipeline_mode = #tpu.pipeline_mode<synchronous>, transform_indices = @transform_4, window_bounds = array<i64: 16, 1>}, {pipeline_mode = #tpu.pipeline_mode<synchronous>, transform_indices = @transform_5, window_bounds = array<i64: 4, 16>}, {pipeline_mode = #tpu.pipeline_mode<synchronous>, transform_indices = @transform_6, window_bounds = array<i64: 4, 1>}, {transform_indices = @transform_7, window_bounds = array<i64: 9, 128>}]} {
    %c0 = arith.constant 0 : index
    %c0_0 = arith.constant 0 : index
    %0 = vector.load %arg1[%c0, %c0_0] : memref<128x128xf32, #tpu.memory_space<vmem>>, vector<128x128xf32>
    %c0_1 = arith.constant 0 : index
    %c0_2 = arith.constant 0 : index
    %1 = vector.load %arg2[%c0_1, %c0_2] : memref<128x32xf32, #tpu.memory_space<vmem>>, vector<128x32xf32>
    %cst = arith.constant dense<0.000000e+00> : vector<128x32xf32>
    %2 = tpu.matmul %0, %1, %cst {dimension_numbers = #tpu.dot_dimension_numbers<[1], [0], [0], [1], [0, 0, 1, 1], [], []>} : vector<128x128xf32>, vector<128x32xf32>, vector<128x32xf32> -> vector<128x32xf32>
    %c0_3 = arith.constant 0 : index
    %c0_4 = arith.constant 0 : index
    %3 = vector.load %arg3[%c0_3, %c0_4] : memref<1x32xf32, #tpu.memory_space<vmem>>, vector<1x32xf32>
    %4 = vector.broadcast %3 : vector<1x32xf32> to vector<128x32xf32>
    %5 = arith.addf %2, %4 : vector<128x32xf32>
    %cst_5 = arith.constant 0.000000e+00 : f32
    %6 = vector.broadcast %cst_5 : f32 to vector<128x32xf32>
    %7 = arith.maximumf %5, %6 : vector<128x32xf32>
    %8 = tpu.transpose %7, [1, 0] : vector<128x32xf32> -> vector<32x128xf32>
    %c0_6 = arith.constant 0 : index
    %c0_7 = arith.constant 0 : index
    %9 = vector.load %arg4[%c0_6, %c0_7] : memref<16x32xf32, #tpu.memory_space<vmem>>, vector<16x32xf32>
    %cst_8 = arith.constant dense<0.000000e+00> : vector<16x128xf32>
    %10 = tpu.matmul %9, %8, %cst_8 {dimension_numbers = #tpu.dot_dimension_numbers<[1], [0], [0], [1], [0, 0, 1, 1], [], []>} : vector<16x32xf32>, vector<32x128xf32>, vector<16x128xf32> -> vector<16x128xf32>
    %c0_9 = arith.constant 0 : index
    %c0_10 = arith.constant 0 : index
    %11 = vector.load %arg5[%c0_9, %c0_10] : memref<16x1xf32, #tpu.memory_space<vmem>>, vector<16x1xf32>
    %12 = vector.broadcast %11 : vector<16x1xf32> to vector<16x128xf32>
    %13 = arith.addf %10, %12 : vector<16x128xf32>
    %cst_11 = arith.constant 0.000000e+00 : f32
    %14 = vector.broadcast %cst_11 : f32 to vector<16x128xf32>
    %15 = arith.maximumf %13, %14 : vector<16x128xf32>
    %c0_12 = arith.constant 0 : index
    %c0_13 = arith.constant 0 : index
    %16 = vector.load %arg6[%c0_12, %c0_13] : memref<4x16xf32, #tpu.memory_space<vmem>>, vector<4x16xf32>
    %cst_14 = arith.constant dense<0.000000e+00> : vector<4x128xf32>
    %17 = tpu.matmul %16, %15, %cst_14 {dimension_numbers = #tpu.dot_dimension_numbers<[1], [0], [0], [1], [0, 0, 1, 1], [], []>} : vector<4x16xf32>, vector<16x128xf32>, vector<4x128xf32> -> vector<4x128xf32>
    %c0_15 = arith.constant 0 : index
    %c0_16 = arith.constant 0 : index
    %18 = vector.load %arg7[%c0_15, %c0_16] : memref<4x1xf32, #tpu.memory_space<vmem>>, vector<4x1xf32>
    %19 = vector.broadcast %18 : vector<4x1xf32> to vector<4x128xf32>
    %20 = arith.addf %17, %19 : vector<4x128xf32>
    %21 = vector.extract_strided_slice %20 {offsets = [0, 0], sizes = [1, 128], strides = [1, 1]} : vector<4x128xf32> to vector<1x128xf32>
    %cst_17 = arith.constant 1.000000e+00 : f32
    %22 = vector.broadcast %cst_17 : f32 to vector<1x128xf32>
    %23 = arith.addf %21, %22 : vector<1x128xf32>
    %24 = vector.extract_strided_slice %20 {offsets = [1, 0], sizes = [1, 128], strides = [1, 1]} : vector<4x128xf32> to vector<1x128xf32>
    %25 = vector.extract_strided_slice %20 {offsets = [2, 0], sizes = [1, 128], strides = [1, 1]} : vector<4x128xf32> to vector<1x128xf32>
    %26 = vector.extract_strided_slice %20 {offsets = [3, 0], sizes = [1, 128], strides = [1, 1]} : vector<4x128xf32> to vector<1x128xf32>
    %27 = arith.mulf %23, %23 : vector<1x128xf32>
    %28 = arith.mulf %24, %24 : vector<1x128xf32>
    %29 = arith.addf %27, %28 : vector<1x128xf32>
    %30 = arith.mulf %25, %25 : vector<1x128xf32>
    %31 = arith.addf %29, %30 : vector<1x128xf32>
    %32 = arith.mulf %26, %26 : vector<1x128xf32>
    %33 = arith.addf %31, %32 : vector<1x128xf32>
    %34 = tpu.reciprocal %33 : vector<1x128xf32> -> vector<1x128xf32>
    %cst_18 = arith.constant 2.000000e+00 : f32
    %35 = vector.broadcast %cst_18 : f32 to vector<1x128xf32>
    %36 = arith.mulf %35, %34 : vector<1x128xf32>
    %37 = arith.mulf %24, %24 : vector<1x128xf32>
    %38 = arith.mulf %25, %25 : vector<1x128xf32>
    %39 = arith.mulf %26, %26 : vector<1x128xf32>
    %40 = arith.mulf %24, %25 : vector<1x128xf32>
    %41 = arith.mulf %24, %26 : vector<1x128xf32>
    %42 = arith.mulf %25, %26 : vector<1x128xf32>
    %43 = arith.mulf %24, %23 : vector<1x128xf32>
    %44 = arith.mulf %25, %23 : vector<1x128xf32>
    %45 = arith.mulf %26, %23 : vector<1x128xf32>
    %46 = arith.addf %38, %39 : vector<1x128xf32>
    %47 = arith.mulf %46, %36 : vector<1x128xf32>
    %cst_19 = arith.constant 1.000000e+00 : f32
    %48 = vector.broadcast %cst_19 : f32 to vector<1x128xf32>
    %49 = arith.subf %48, %47 : vector<1x128xf32>
    %50 = arith.subf %40, %45 : vector<1x128xf32>
    %51 = arith.mulf %50, %36 : vector<1x128xf32>
    %52 = arith.addf %41, %44 : vector<1x128xf32>
    %53 = arith.mulf %52, %36 : vector<1x128xf32>
    %54 = arith.addf %40, %45 : vector<1x128xf32>
    %55 = arith.mulf %54, %36 : vector<1x128xf32>
    %56 = arith.addf %37, %39 : vector<1x128xf32>
    %57 = arith.mulf %56, %36 : vector<1x128xf32>
    %cst_20 = arith.constant 1.000000e+00 : f32
    %58 = vector.broadcast %cst_20 : f32 to vector<1x128xf32>
    %59 = arith.subf %58, %57 : vector<1x128xf32>
    %60 = arith.subf %42, %43 : vector<1x128xf32>
    %61 = arith.mulf %60, %36 : vector<1x128xf32>
    %62 = arith.subf %41, %44 : vector<1x128xf32>
    %63 = arith.mulf %62, %36 : vector<1x128xf32>
    %64 = arith.addf %42, %43 : vector<1x128xf32>
    %65 = arith.mulf %64, %36 : vector<1x128xf32>
    %66 = arith.addf %37, %38 : vector<1x128xf32>
    %67 = arith.mulf %66, %36 : vector<1x128xf32>
    %cst_21 = arith.constant 1.000000e+00 : f32
    %68 = vector.broadcast %cst_21 : f32 to vector<1x128xf32>
    %69 = arith.subf %68, %67 : vector<1x128xf32>
    %70 = tpu.concatenate %49, %51, %53, %55, %59, %61, %63, %65, %69 in 0 : vector<1x128xf32>, vector<1x128xf32>, vector<1x128xf32>, vector<1x128xf32>, vector<1x128xf32>, vector<1x128xf32>, vector<1x128xf32>, vector<1x128xf32>, vector<1x128xf32> -> vector<9x128xf32>
    %c0_22 = arith.constant 0 : index
    %c0_23 = arith.constant 0 : index
    %71 = vector.load %arg8[%c0_22, %c0_23] : memref<9x128xf32, #tpu.memory_space<vmem>>, vector<9x128xf32>
    tpu.vector_store %arg8[%c0_22, %c0_23], %70 {strides = array<i32>} : memref<9x128xf32, #tpu.memory_space<vmem>>, vector<9x128xf32>,
    return
  }
  func.func @transform_0(%arg0: i32) -> (i32, i32) {
    %c0_i32 = arith.constant 0 : i32
    %c0_i32_0 = arith.constant 0 : i32
    return %arg0, %c0_i32 : i32, i32
  }
  func.func @transform_1(%arg0: i32) -> (i32, i32) {
    %c0_i32 = arith.constant 0 : i32
    %c0_i32_0 = arith.constant 0 : i32
    %c0_i32_1 = arith.constant 0 : i32
    return %c0_i32, %c0_i32_0 : i32, i32
  }
  func.func @transform_2(%arg0: i32) -> (i32, i32) {
    %c0_i32 = arith.constant 0 : i32
    %c0_i32_0 = arith.constant 0 : i32
    %c0_i32_1 = arith.constant 0 : i32
    return %c0_i32, %c0_i32_0 : i32, i32
  }
  func.func @transform_3(%arg0: i32) -> (i32, i32) {
    %c0_i32 = arith.constant 0 : i32
    %c0_i32_0 = arith.constant 0 : i32
    %c0_i32_1 = arith.constant 0 : i32
    return %c0_i32, %c0_i32_0 : i32, i32
  }
  func.func @transform_4(%arg0: i32) -> (i32, i32) {
    %c0_i32 = arith.constant 0 : i32
    %c0_i32_0 = arith.constant 0 : i32
    %c0_i32_1 = arith.constant 0 : i32
    return %c0_i32, %c0_i32_0 : i32, i32
  }
  func.func @transform_5(%arg0: i32) -> (i32, i32) {
    %c0_i32 = arith.constant 0 : i32
    %c0_i32_0 = arith.constant 0 : i32
    %c0_i32_1 = arith.constant 0 : i32
    return %c0_i32, %c0_i32_0 : i32, i32
  }
  func.func @transform_6(%arg0: i32) -> (i32, i32) {
    %c0_i32 = arith.constant 0 : i32
    %c0_i32_0 = arith.constant 0 : i32
    %c0_i32_1 = arith.constant 0 : i32
    return %c0_i32, %c0_i32_0 : i32, i32
  }
  func.func @transform_7(%arg0: i32) -> (i32, i32) {
    %c0_i32 = arith.constant 0 : i32
    %c0_i32_0 = arith.constant 0 : i32
    return %c0_i32, %arg0 : i32, i32
  }
}

</mosaic_0001>

<bundles_post_ra>
// kernel: tpu_custom_call.1
= control target key start
LH: loop header
LB: loop body
LE: loop exit
PB: predicated region body
PF: predicated region fallthrough
CT: control target
= control target key end

     0   :  { %s989_s0 = inlined_call_operand.vmem [shape: f32[128,128], index: 0, kind: input, shape index: {}]   ;;  %s990_s1 = inlined_call_operand.vmem [shape: f32[128,32], index: 1, kind: input, shape index: {}]   ;;  %s991_s2 = inlined_call_operand.vmem [shape: f32[1,32], index: 2, kind: input, shape index: {}]   ;;  %s992_s3 = inlined_call_operand.vmem [shape: f32[16,32], index: 3, kind: input, shape index: {}]   ;;  %s993_s4 = inlined_call_operand.vmem [shape: f32[16,1], index: 4, kind: input, shape index: {}]   ;;  %s994_s5 = inlined_call_operand.vmem [shape: f32[4,16], index: 5, kind: input, shape index: {}]   ;;  %s995_s6 = inlined_call_operand.vmem [shape: f32[4,1], index: 6, kind: input, shape index: {}]   ;;  %s996_s7 = inlined_call_operand.hbm [shape: f32[9,128], index: 7, kind: output, shape index: {}]  }
   0x1   :  { %v58_v0 = vld [vmem:[%s990_s1 + $0x78] sm:$0xff]  ;;  %v57_v1 = vld [vmem:[%s990_s1 + $0x70] sm:$0xff]  ;;  %v56_v2 = vld [vmem:[%s990_s1 + $0x68] sm:$0xff] }
   0x2   :  { %649 = vmatprep.subr.mxu0 %v58_v0  ;;  %v55_v3 = vld [vmem:[%s990_s1 + $0x60] sm:$0xff]  ;;  %v54_v5 = vld [vmem:[%s990_s1 + $0x58] sm:$0xff]  ;;  %v53_v6 = vld [vmem:[%s990_s1 + $0x50] sm:$0xff] }
   0x3   :  { %650 = vmatpush3.msra.mxu0 %v58_v0  ;;  %v27_v4 = vld [vmem:[%s989_s0] sm:$0xff]  ;;  %v52_v7 = vld [vmem:[%s990_s1 + $0x48] sm:$0xff] }
   0x4   :  { %651 = vmatprep.subr.mxu0 %v57_v1  ;;  %681 = vmatprep.mubr.f32.mxu0 %v27_v4 }
   0x5   :  { %652 = vmatpush3.msra.mxu0 %v57_v1 }
   0x6   :  { %653 = vmatprep.subr.mxu0 %v56_v2 }
   0x7   :  { %654 = vmatpush3.msra.mxu0 %v56_v2 }
   0x8   :  { %655 = vmatprep.subr.mxu0 %v55_v3 }
   0x9   :  { %656 = vmatpush3.msra.mxu0 %v55_v3 }
   0xa   :  { %657 = vmatprep.subr.mxu0 %v54_v5 }
   0xb   :  { %658 = vmatpush3.msra.mxu0 %v54_v5 }
   0xc   :  { %12 = vsyncpa [#allocation3], 0  ;;  %659 = vmatprep.subr.mxu0 %v53_v6  ;;  %v51_v8 = vld [vmem:[%s990_s1 + $0x40] sm:$0xff]  ;;  %v50_v9 = vld [vmem:[%s990_s1 + $0x38] sm:$0xff]  ;;  %vm241_vm0 = vcmask 261120   ;;  %v779_v34 = vmov 0  }
   0xd   :  { %660 = vmatpush3.msra.mxu0 %v53_v6  ;;  %v49_v10 = vld [vmem:[%s990_s1 + $0x30] sm:$0xff]  ;;  %v48_v11 = vld [vmem:[%s990_s1 + $0x28] sm:$0xff]  ;;  %v47_v12 = vld [vmem:[%s990_s1 + $0x20] sm:$0xff]  ;;  %753 = vset.pattern.permute.xlu0 %v779_v34  ;;  %vm781_vm1 = vmmov 0   ;;  %vm380_vm2 = vcmask 130048   ;;  %vm544_vm3 = vcmask 1040384  }
   0xe   :  { %661 = vmatprep.subr.mxu0 %v52_v7  ;;  %v46_v13 = vld [vmem:[%s990_s1 + $0x18] sm:$0xff]  ;;  %v45_v14 = vld [vmem:[%s990_s1 + $0x10] sm:$0xff]  ;;  %v44_v15 = vld [vmem:[%s990_s1 + $0x8] sm:$0xff]  ;;  %754 = vset.pattern.permute.xlu1 %v779_v34  ;;  %vm546_vm4 = vcmask 1041408   ;;  %vm548_vm5 = vcmask 1042432   ;;  %vm550_vm6 = vcmask 1043456  }
   0xf   :  { %662 = vmatpush3.msra.mxu0 %v52_v7  ;;  %v43_v16 = vld [vmem:[%s990_s1] sm:$0xff]  ;;  %v28_v17 = vld [vmem:[%s989_s0 + $0x8] sm:$0xff]  ;;  %v29_v18 = vld [vmem:[%s989_s0 + $0x10] sm:$0xff]  ;;  %vm552_vm7 = vcmask 1044480   ;;  %vm554_vm8 = vcmask 1045504   ;;  %vm556_vm9 = vcmask 1046528  }
  0x10   :  { %663 = vmatprep.subr.mxu0 %v51_v8  ;;  %v30_v19 = vld [vmem:[%s989_s0 + $0x18] sm:$0xff]  ;;  %v31_v20 = vld [vmem:[%s989_s0 + $0x20] sm:$0xff]  ;;  %v32_v21 = vld [vmem:[%s989_s0 + $0x28] sm:$0xff] }
  0x11   :  { %664 = vmatpush3.msra.mxu0 %v51_v8  ;;  %v33_v22 = vld [vmem:[%s989_s0 + $0x30] sm:$0xff]  ;;  %v34_v23 = vld [vmem:[%s989_s0 + $0x38] sm:$0xff]  ;;  %v35_v24 = vld [vmem:[%s989_s0 + $0x40] sm:$0xff] }
  0x12   :  { %665 = vmatprep.subr.mxu0 %v50_v9  ;;  %v36_v25 = vld [vmem:[%s989_s0 + $0x48] sm:$0xff]  ;;  %v37_v26 = vld [vmem:[%s989_s0 + $0x50] sm:$0xff]  ;;  %v38_v27 = vld [vmem:[%s989_s0 + $0x58] sm:$0xff] }
  0x13   :  { %666 = vmatpush3.msra.mxu0 %v50_v9  ;;  %v39_v28 = vld [vmem:[%s989_s0 + $0x60] sm:$0xff]  ;;  %v40_v29 = vld [vmem:[%s989_s0 + $0x68] sm:$0xff]  ;;  %v41_v30 = vld [vmem:[%s989_s0 + $0x70] sm:$0xff] }
  0x14   :  { %667 = vmatprep.subr.mxu0 %v49_v10  ;;  %v42_v31 = vld [vmem:[%s989_s0 + $0x78] sm:$0xff]  ;;  %v227_v32 = vld [vmem:[%s992_s3] sm:$0xff]  ;;  %v230_v33 = vld [vmem:[%s993_s4 + $0x8] sm:$0xff] }
  0x15   :  { %668 = vmatpush3.msra.mxu0 %v49_v10  ;;  %737 = vmatprep.mubr.msk.f32.mxu1 %vm241_vm0, %v227_v32  ;;  %v229_v35 = vld [vmem:[%s993_s4] sm:$0xff] }
  0x16   :  { %669 = vmatprep.subr.mxu0 %v48_v11  ;;  %238 = vperm.xlu0 %753, %v230_v33   ;;  %v576_v50 = vld [vmem:[%s991_s2] ss:$0 sm:$0xff] }
  0x17   :  { %670 = vmatpush3.msra.mxu0 %v48_v11  ;;  %v373_v32 = vld [vmem:[%s994_s5] sm:$0xf]  ;;  %s782_s5 = smov [#allocation2]  }
  0x18   :  { %671 = vmatprep.subr.mxu0 %v47_v12 }
  0x19   :  { %672 = vmatpush3.msra.mxu0 %v47_v12 }
  0x1a   :  { %673 = vmatprep.subr.mxu0 %v46_v13  ;;  %233 = vperm.xlu0 %753, %v229_v35  }
  0x1b   :  { %674 = vmatpush3.msra.mxu0 %v46_v13 }
  0x1c   :  { %675 = vmatprep.subr.mxu0 %v45_v14 }
  0x1d   :  { %676 = vmatpush3.msra.mxu0 %v45_v14 }
  0x1e   :  { %677 = vmatprep.subr.mxu0 %v44_v15 }
  0x1f   :  { %678 = vmatpush3.msra.mxu0 %v44_v15 }
  0x20   :  { %679 = vmatprep.subr.mxu0 %v43_v16 }
  0x21   :  { %680 = vmatpush3.msra.mxu0 %v43_v16 }
  0x22   :  { %682 = vmatmul.mubr.f32.vlgmr.msra.gmra.mxu0 %v28_v17 }
  0x23   :  { %684 = vmatprep.mubr.f32.mxu0 %v29_v18 }
  0x26   :  { %685 = vmatmul.mubr.f32.gmra.mxu0 %v30_v19 }
  0x27   :  { %687 = vmatprep.mubr.f32.mxu0 %v31_v20 }
  0x2a   :  { %688 = vmatmul.mubr.f32.gmra.mxu0 %v32_v21  ;;  %v228_v21 = vld [vmem:[%s992_s3 + $0x8] sm:$0xff] }
  0x2b   :  { %690 = vmatprep.mubr.f32.mxu0 %v33_v22  ;;  %v780_v22 = vmov 0.0  }
  0x2c   :  { %740 = vmatprep.subr.mxu0 %v780_v22 }
  0x2e   :  { %691 = vmatmul.mubr.f32.gmra.mxu0 %v34_v23  ;;  %v374_v23 = vld [vmem:[%s995_s6] sm:$0xf]  ;;  %s565_s6 = sshll.u32 %s782_s5, 4  ;;  %s566_s6 = int_to_ptr.vmem [resolvable:$true] %s565_s6 }
  0x2f   :  { %693 = vmatprep.mubr.f32.mxu0 %v35_v24  ;;  %377 = vperm.xlu1 %754, %v374_v23   ;;  %s757_s27 = scalar_lea.vmem %s566_s6, 256  ;;  %p762_p1 = scmp.lt.s32.totalorder %s566_s6, %s566_s6 }
  0x30   :  { %p758_p0 = scmp.ne.s32.totalorder %s566_s6, %s757_s27  ;;  %p763_p2 = scmp.lt.s32.totalorder %s757_s27, %s757_s27 }
  0x32   :  { %694 = vmatmul.mubr.f32.gmra.mxu0 %v36_v25  ;;  %p764_p3 = por %p763_p2, %p762_p1 }
  0x33   :  { %696 = vmatprep.mubr.f32.mxu0 %v37_v26 }
  0x34   :  { %p765_p4 = pnand %p764_p3, %p758_p0 }
  0x36   :  { %697 = vmatmul.mubr.f32.gmra.mxu0 %v38_v27 }
  0x37   :  { %699 = vmatprep.mubr.f32.mxu0 %v39_v28 }
  0x3a   :  { %700 = vmatmul.mubr.f32.gmra.mxu0 %v40_v29 }
  0x3b   :  { %702 = vmatprep.mubr.f32.mxu0 %v41_v30 }
  0x3e   :  { %703 = vmatmul.mubr.f32.gmra.mxu0 %v42_v31 }
  0x3f   :  { %744 = vmatprep.mubr.msk.f32.mxu0 %vm781_vm1, %v780_v22 }
  0x91   :  { %v239_v24 = vpop.permute.xlu0 %238 }
  0x95   :  { %v234_v27 = vpop.permute.xlu0 %233 }
  0xaa   :  { %v378_v33 = vpop.permute.xlu1 %377 }
  0xe2   :  { %v931_v36 = vpop.f32.mrf.mxu0 }
  0xe3   :  { %v138_v16 = vadd.f32 %v931_v36, %v576_v50 }
  0xe4   :  { %v933_v37 = vpop.f32.mrf.mxu0 }
  0xe5   :  { %v212_v18 = vmax.f32 %v138_v16, 0.0  ;;  %v133_v19 = vadd.f32 %v576_v50, %v933_v37 }
  0xe6   :  { %v686_v38 = vpop.f32.mrf.mxu0 }
  0xe7   :  { %v148_v12 = vadd.f32 %v686_v38, %v576_v50  ;;  %v211_v20 = vmax.f32 %v133_v19, 0.0 }
  0xe8   :  { %v935_v39 = vpop.f32.mrf.mxu0 }
  0xe9   :  { %v214_v14 = vmax.f32 %v148_v12, 0.0  ;;  %v143_v15 = vadd.f32 %v576_v50, %v935_v39 }
  0xea   :  { %v689_v40 = vpop.f32.mrf.mxu0 }
  0xeb   :  { %v158_v8 = vadd.f32 %v689_v40, %v576_v50  ;;  %v213_v17 = vmax.f32 %v143_v15, 0.0 }
  0xec   :  { %v152_v41 = vpop.f32.mrf.mxu0 }
  0xed   :  { %v216_v10 = vmax.f32 %v158_v8, 0.0  ;;  %v153_v11 = vadd.f32 %v576_v50, %v152_v41 }
  0xee   :  { %v692_v42 = vpop.f32.mrf.mxu0 }
  0xef   :  { %v168_v4 = vadd.f32 %v692_v42, %v576_v50  ;;  %v215_v13 = vmax.f32 %v153_v11, 0.0 }
  0xf0   :  { %v162_v43 = vpop.f32.mrf.mxu0 }
  0xf1   :  { %v218_v6 = vmax.f32 %v168_v4, 0.0  ;;  %v163_v7 = vadd.f32 %v576_v50, %v162_v43 }
  0xf2   :  { %v695_v44 = vpop.f32.mrf.mxu0 }
  0xf3   :  { %v178_v0 = vadd.f32 %v695_v44, %v576_v50  ;;  %v217_v9 = vmax.f32 %v163_v7, 0.0 }
  0xf4   :  { %v172_v45 = vpop.f32.mrf.mxu0 }
  0xf5   :  { %v220_v2 = vmax.f32 %v178_v0, 0.0  ;;  %v173_v3 = vadd.f32 %v576_v50, %v172_v45 }
  0xf6   :  { %v698_v46 = vpop.f32.mrf.mxu0 }
  0xf7   :  { %v188_v60 = vadd.f32 %v698_v46, %v576_v50  ;;  %v219_v5 = vmax.f32 %v173_v3, 0.0 }
  0xf8   :  { %v182_v47 = vpop.f32.mrf.mxu0 }
  0xf9   :  { %v222_v62 = vmax.f32 %v188_v60, 0.0  ;;  %v183_v63 = vadd.f32 %v576_v50, %v182_v47 }
  0xfa   :  { %v701_v48 = vpop.f32.mrf.mxu0 }
  0xfb   :  { %v198_v56 = vadd.f32 %v701_v48, %v576_v50  ;;  %v221_v1 = vmax.f32 %v183_v63, 0.0 }
  0xfc   :  { %v192_v49 = vpop.f32.mrf.mxu0 }
  0xfd   :  { %v224_v58 = vmax.f32 %v198_v56, 0.0  ;;  %v193_v59 = vadd.f32 %v576_v50, %v192_v49 }
  0xfe   :  { %v704_v51 = vpop.f32.mrf.mxu0 }
  0xff   :  { %v208_v52 = vadd.f32 %v704_v51, %v576_v50  ;;  %v223_v61 = vmax.f32 %v193_v59, 0.0 }
 0x100   :  { %v202_v53 = vpop.f32.mrf.mxu0 }
 0x101   :  { %v226_v54 = vmax.f32 %v208_v52, 0.0  ;;  %v203_v55 = vadd.f32 %v576_v50, %v202_v53 }
 0x103   :  { %v225_v57 = vmax.f32 %v203_v55, 0.0  ;;  %705 = vmatprep.subr.msk.mxu1 %vm241_vm0, %v226_v54 }
 0x104   :  { %706 = vmatpush3.xpose.msk.msra.mxu1 %vm241_vm0, %v226_v54 }
 0x105   :  { %707 = vmatprep.subr.msk.mxu1 %vm241_vm0, %v225_v57 }
 0x108   :  { %708 = vmatpush3.xpose.msk.msra.mxu1 %vm241_vm0, %v225_v57 }
 0x109   :  { %709 = vmatprep.subr.msk.mxu1 %vm241_vm0, %v224_v58 }
 0x10c   :  { %710 = vmatpush3.xpose.msk.msra.mxu1 %vm241_vm0, %v224_v58 }
 0x10d   :  { %711 = vmatprep.subr.msk.mxu1 %vm241_vm0, %v223_v61 }
 0x110   :  { %712 = vmatpush3.xpose.msk.msra.mxu1 %vm241_vm0, %v223_v61 }
 0x111   :  { %713 = vmatprep.subr.msk.mxu1 %vm241_vm0, %v222_v62 }
 0x114   :  { %714 = vmatpush3.xpose.msk.msra.mxu1 %vm241_vm0, %v222_v62 }
 0x115   :  { %715 = vmatprep.subr.msk.mxu1 %vm241_vm0, %v221_v1 }
 0x118   :  { %716 = vmatpush3.xpose.msk.msra.mxu1 %vm241_vm0, %v221_v1 }
 0x119   :  { %717 = vmatprep.subr.msk.mxu1 %vm241_vm0, %v220_v2 }
 0x11c   :  { %718 = vmatpush3.xpose.msk.msra.mxu1 %vm241_vm0, %v220_v2 }
 0x11d   :  { %719 = vmatprep.subr.msk.mxu1 %vm241_vm0, %v219_v5 }
 0x120   :  { %720 = vmatpush3.xpose.msk.msra.mxu1 %vm241_vm0, %v219_v5 }
 0x121   :  { %721 = vmatprep.subr.msk.mxu1 %vm241_vm0, %v218_v6 }
 0x124   :  { %722 = vmatpush3.xpose.msk.msra.mxu1 %vm241_vm0, %v218_v6 }
 0x125   :  { %723 = vmatprep.subr.msk.mxu1 %vm241_vm0, %v217_v9 }
 0x128   :  { %724 = vmatpush3.xpose.msk.msra.mxu1 %vm241_vm0, %v217_v9 }
 0x129   :  { %725 = vmatprep.subr.msk.mxu1 %vm241_vm0, %v216_v10 }
 0x12c   :  { %726 = vmatpush3.xpose.msk.msra.mxu1 %vm241_vm0, %v216_v10 }
 0x12d   :  { %727 = vmatprep.subr.msk.mxu1 %vm241_vm0, %v215_v13 }
 0x130   :  { %728 = vmatpush3.xpose.msk.msra.mxu1 %vm241_vm0, %v215_v13 }
 0x131   :  { %729 = vmatprep.subr.msk.mxu1 %vm241_vm0, %v214_v14 }
 0x134   :  { %730 = vmatpush3.xpose.msk.msra.mxu1 %vm241_vm0, %v214_v14 }
 0x135   :  { %731 = vmatprep.subr.msk.mxu1 %vm241_vm0, %v213_v17 }
 0x138   :  { %732 = vmatpush3.xpose.msk.msra.mxu1 %vm241_vm0, %v213_v17 }
 0x139   :  { %733 = vmatprep.subr.msk.mxu1 %vm241_vm0, %v212_v18 }
 0x13c   :  { %734 = vmatpush3.xpose.msk.msra.mxu1 %vm241_vm0, %v212_v18 }
 0x13d   :  { %735 = vmatprep.subr.msk.mxu1 %vm241_vm0, %v211_v20 }
 0x140   :  { %736 = vmatpush3.xpose.msk.msra.mxu1 %vm241_vm0, %v211_v20 }
 0x143   :  { %738 = vmatmul.mubr.msk.f32.vlgmr.msra.gmra.mxu1 %vm241_vm0, %v228_v21 }
 0x203   :  { %v739_v25 = vpop.f32.mrf.mxu1 }
 0x204   :  { %v368_v26 = vadd.f32 %v739_v25, %v239_v24 }
 0x205   :  { %v362_v28 = vpop.f32.mrf.mxu1 }
 0x206   :  { %v372_v29 = vmax.f32 %v368_v26, 0.0  ;;  %v363_v30 = vadd.f32 %v362_v28, %v234_v27 }
 0x208   :  { %v371_v31 = vmax.f32 %v363_v30, 0.0  ;;  %741 = vmatpush3.msra.mxu0 %v372_v29 }
 0x209   :  { %742 = vmatprep.subr.mxu0 %v780_v22 }
 0x20a   :  { %743 = vmatpush3.msra.mxu0 %v371_v31 }
 0x20b   :  { %745 = vmatmul.mubr.msk.f32.vlgmr.msra.gmra.mxu0 %vm380_vm2, %v373_v32 }
 0x2cb   :  { %v450_v34 = vpop.f32.mrf.mxu0 }
 0x2cc   :  { %v451_v35 = vadd.f32 %v450_v34, %v378_v33 }
 0x2cd   :  { %v746_v36 = vpop.f32.mrf.mxu0 }
 0x2ce   :  { %v454_v37 = vadd.f32 1.0, %v451_v35  ;;  %v456_v38 = vmul.f32 %v451_v35, %v451_v35  ;;  %v473_v51 = vrot.slane %v451_v35, 2  ;;  %v470_v53 = vrot.slane %v451_v35, 1 }
 0x2d0   :  { %v455_v39 = vmul.f32 %v454_v37, %v454_v37  ;;  %v458_v40 = vrot.slane %v456_v38, 1  ;;  %v461_v42 = vrot.slane %v456_v38, 2  ;;  %v464_v44 = vrot.slane %v456_v38, 3 }
 0x2d1   :  { %v480_v46 = vrot.slane %v454_v37, 6  ;;  %v483_v47 = vrot.slane %v454_v37, 5  ;;  %v477_v48 = vrot.slane %v454_v37, 7  ;;  %v475_v58 = vmul.f32 %v473_v51, %v451_v35 }
 0x2d2   :  { %v460_v41 = vadd.f32 %v458_v40, %v455_v39  ;;  %v472_v60 = vmul.f32 %v470_v53, %v451_v35  ;;  %v486_v61 = vadd.f32 %v458_v40, %v456_v38  ;;  %v506_v1 = vadd.f32 %v461_v42, %v456_v38 }
 0x2d3   :  { %v482_v49 = vmul.f32 %v480_v46, %v451_v35  ;;  %v485_v50 = vmul.f32 %v483_v47, %v451_v35  ;;  %v479_v52 = vmul.f32 %v477_v48, %v451_v35 }
 0x2d4   :  { %v463_v43 = vadd.f32 %v461_v42, %v460_v41 }
 0x2d5   :  { %v500_v55 = vrot.slane %v482_v49, 1  ;;  %v493_v57 = vrot.slane %v485_v50, 2  ;;  %v510_v59 = vrot.slane %v479_v52, 7 }
 0x2d6   :  { %v466_v45 = vadd.f32 %v464_v44, %v463_v43 }
 0x2d7   :  { %v502_v0 = vadd.f32 %v500_v55, %v475_v58  ;;  %v504_v3 = vadd.f32 %v493_v57, %v472_v60  ;;  %v512_v6 = vsub.f32 %v472_v60, %v510_v59  ;;  %v495_v8 = vsub.f32 %v472_v60, %v493_v57 }
 0x2d8   :  { %755 = vrcp.f32 %v466_v45  ;;  %v514_v12 = vsub.f32 %v475_v58, %v500_v55  ;;  %v516_v13 = vadd.f32 %v510_v59, %v472_v60 }
 0x2e5   :  { %v756_v54 = vpop.eup %755 }
 0x2e6   :  { %v468_v56 = vmul.f32 2.0, %v756_v54 }
 0x2e8   :  { %v488_v62 = vrot.slane %v468_v56, 6  ;;  %v496_v63 = vrot.slane %v468_v56, 7 }
 0x2ea   :  { %v490_v2 = vmul.f32 %v488_v62, %v486_v61  ;;  %v503_v4 = vmul.f32 %v502_v0, %v496_v63  ;;  %v507_v5 = vmul.f32 %v506_v1, %v496_v63  ;;  %v505_v9 = vmul.f32 %v504_v3, %v496_v63 }
 0x2eb   :  { %v518_v10 = vmul.f32 %v496_v63, %v486_v61  ;;  %v498_v14 = vmul.f32 %v496_v63, %v495_v8  ;;  %v513_v15 = vmul.f32 %v512_v6, %v488_v62  ;;  %v515_v18 = vmul.f32 %v514_v12, %v496_v63 }
 0x2ec   :  { %v491_v7 = vsub.f32 1.0, %v490_v2  ;;  %v508_v11 = vsub.f32 1.0, %v507_v5  ;;  %v524_v19 = vrot.slane %v503_v4, 7  ;;  %v517_v20 = vmul.f32 %v516_v13, %v488_v62 }
 0x2ed   :  { %v519_v16 = vsub.f32 1.0, %v518_v10  ;;  %v527_v21 = vrot.slane %v505_v9, 6  ;;  %v533_v26 = vrot.slane %v513_v15, 5  ;;  %v536_v28 = vrot.slane %v515_v18, 3 }
 0x2ee   :  { %v521_v17 = vrot.slane %v491_v7, 2  ;;  %v530_v24 = vrot.slane %v508_v11, 5  ;;  %v539_v30 = vrot.slane %v517_v20, 3 }
 0x2ef   :  { %v542_v22 = vrot.slane %v519_v16, 1 }
 0x2f0   :  { %v545_v23 = vsel %vm544_vm3, %v521_v17, %v498_v14 }
 0x2f1   :  { %v547_v25 = vsel %vm546_vm4, %v545_v23, %v524_v19  ;;  %559 = vst [vmem:[#allocation2 + $0x8] sm:$0x1] %v542_v22 }
 0x2f2   :  { %v549_v27 = vsel %vm548_vm5, %v547_v25, %v527_v21 }
 0x2f3   :  { %v551_v29 = vsel %vm550_vm6, %v549_v27, %v530_v24 }
 0x2f4   :  { %v553_v31 = vsel %vm552_vm7, %v551_v29, %v533_v26 }
 0x2f5   :  { %v555_v32 = vsel %vm554_vm8, %v553_v31, %v536_v28 }
 0x2f6   :  { %v557_v33 = vsel %vm556_vm9, %v555_v32, %v539_v30 }
 0x2f7   :  { %558 = vst [vmem:[#allocation2] sm:$0xff] %v557_v33 }
 0x2f8   :  { %768 = shalt.err (!%p765_p4)
}
 0x2f9   :  { %s783_s28 = smov 128   ;;  %s784_s29 = smov 8  }
 0x2fa   :  { %571 = dma.vmem_to_hbm [thread:$0]  %s566_s6, 256, %s996_s7, [#allocation3], %s783_s28, %s783_s28, %s784_s29  }
 0x2fb   :  { %777 = dma.done.wait [#allocation3], 256  }
 0x2fc   :  { %778 = vsyncadd [#allocation3], 4294967040 }
 0x2fd   :  { %575 = vsyncpa [#allocation3], 1 }

</bundles_post_ra>
